<compile_context>
chip_gen: v7x
topology: tpu7x:2x2x1
jax: 0.10.0
libtpu: 0.0.40
codegen_flags: <defaults>
</compile_context>

<pallas_src>
import functools

import jax
import jax.numpy as jnp
import numpy as np
from jax.experimental import pallas as pl
from jax.experimental.pallas import tpu as pltpu

LANE = 128  # TPU lane width; channel padding target


# --------------------------- Pallas kernel ---------------------------------- #

def _stack_cnn_kernel(x_ref, w_ref, b_ref, o_ref, buf_a, buf_b, *,
                      layer_lens, kernel_size, padding, n_tile, c_in, c_pad,
                      use_tap_accum):
    """Fused StackCNN forward (all layers + global max pool), one batch tile.

    x_ref:  (n_tile, L0, C_in)                input tile (channels NOT padded)
    w_ref:  (num_layers, K, C_pad, C_pad)     packed bf16 weights (tap-major)
    b_ref:  (num_layers, 1, C_pad)            packed f32 biases (0 in pad lanes)
    o_ref:  (n_tile, C_pad)                   pooled output (lane-dense)
    buf_a/buf_b: (n_tile, L_pad_alloc, C_pad) ping-pong padded activations
    """
    k = kernel_size
    p = padding
    bufs = (buf_a, buf_b)
    num_layers = len(layer_lens)

    def _zero_margins(dst, l_in):
        # Only the conv zero-padding rows are cleared; the interior rows
        # [p, p + l_in) are fully overwritten by the writer.
        if p > 0:
            zrow = jnp.zeros((n_tile, p, c_pad), jnp.float32)
            dst[:, 0:p, :] = zrow
            dst[:, p + l_in:l_in + 2 * p, :] = zrow

    # ---- place the (channel-unpadded) input into buffer 0's interior ------ #
    l0 = layer_lens[0][0]
    _zero_margins(bufs[0], l0)
    if c_in < c_pad:
        # Zero the full lane width first (padded lanes must be exactly 0),
        # then drop the real channels into the first C_in lanes.
        bufs[0][:, p:p + l0, :] = jnp.zeros((n_tile, l0, c_pad), jnp.float32)
        bufs[0][:, p:p + l0, 0:c_in] = x_ref[...]
    else:
        bufs[0][:, p:p + l0, :] = x_ref[...]

    # ---- conv + ReLU stack ------------------------------------------------- #
    for li, (l_in, l_out) in enumerate(layer_lens):
        src = bufs[li % 2]
        rows = n_tile * l_out

        if use_tap_accum:
            # v7x: K small matmuls accumulated in-place (MRB); no im2col copy.
            acc = jnp.zeros((rows, c_pad), jnp.float32)
            for kk in range(k):
                a = src[:, kk:kk + l_out, :].astype(jnp.bfloat16)
                a = a.reshape(rows, c_pad)
                acc = acc + jnp.dot(a, w_ref[li, kk],
                                    preferred_element_type=jnp.float32)
        else:
            # v5e/v6e: one wide matmul over the bf16 im2col (depth K*C_pad).
            taps = [src[:, kk:kk + l_out, :].astype(jnp.bfloat16)
                    for kk in range(k)]
            im2col = jnp.concatenate(taps, axis=-1).reshape(rows, k * c_pad)
            acc = jnp.dot(im2col, w_ref[li].reshape(k * c_pad, c_pad),
                          preferred_element_type=jnp.float32)

        # bias + ReLU epilogue in f32 (v5e-safe). Padded output lanes stay 0
        # because their weights and biases are 0 and ReLU(0) = 0.
        y = jnp.maximum(acc + b_ref[li], 0.0)

        if li == num_layers - 1:
            # Fused AdaptiveMaxPool1d(1) + squeeze(-1): max over L, lane-dense.
            o_ref[...] = jnp.max(y.reshape(n_tile, l_out, c_pad), axis=1)
        else:
            nxt = bufs[(li + 1) % 2]
            _zero_margins(nxt, l_out)
            nxt[:, p:p + l_out, :] = y.reshape(n_tile, l_out, c_pad)


# ------------------------------ Wrapper -------------------------------------- #

def _choose_batch_tile(n, layer_lens, k, c_pad, l_pad_alloc, vmem_limit_bytes):
    """Batch tile: fit a per-step VMEM budget, target matmul M >= 256 rows,
    and respect the output-block sublane rule (multiple of 8 or whole batch)."""
    per_sample = (
        2 * l_pad_alloc * c_pad * 4      # ping-pong padded activations (f32)
        + l_pad_alloc * k * c_pad * 2    # bf16 matmul operand (taps / im2col)
        + 2 * l_pad_alloc * c_pad * 4    # f32 accumulator + epilogue value
        + 2 * l_pad_alloc * c_pad * 4    # headroom (DMA double-buffers, spills)
    )
    budget = max(vmem_limit_bytes // 2, per_sample)
    fit = max(1, budget // per_sample)
    min_l_out = min(lo for _, lo in layer_lens)
    want = -(-256 // min_l_out)          # rows so the MXU M dim reaches ~256
    nt = min(n, fit, max(want, 8))
    if nt >= n:
        return n
    return min(n, max(8, (nt // 8) * 8))


def stack_cnn_forward(x_ncl, params, *, padding):
    """Full StackCNN forward. x_ncl: PyTorch-style (N, C_in, L). Returns (N, C_out)."""
    n, c_in, l0 = x_ncl.shape
    c_out, _, k = params[0][0].shape
    num_layers = len(params)
    for (w, _) in params[1:]:
        assert w.shape == (c_out, c_out, k), "all stacked layers share C_out/K"

    # Channel padding target (lane width multiple) for intermediate activations.
    c_pad = ((max(c_in, c_out) + LANE - 1) // LANE) * LANE

    # Static per-layer lengths (stride = 1).
    layer_lens = []
    l_cur = l0
    for _ in range(num_layers):
        l_out = l_cur + 2 * padding - k + 1
        assert l_out >= 1, "kernel larger than (padded) sequence"
        layer_lens.append((l_cur, l_out))
        l_cur = l_out
    l_pad_max = max(li + 2 * padding for (li, _) in layer_lens)
    l_pad_alloc = ((l_pad_max + 7) // 8) * 8      # round sublane dim up to 8

    # ---- TPU generation heuristics ------------------------------------------ #
    kind = ""
    try:
        kind = jax.devices()[0].device_kind.lower()
    except Exception:
        pass
    is_v7 = ("v7" in kind) or ("tpu7" in kind) or ("7x" in kind)
    use_tap_accum = is_v7                       # MRB in-place accumulation
    vmem_limit = (28 << 20) if is_v7 else (64 << 20)

    # ---- batch tiling -------------------------------------------------------- #
    n_tile = _choose_batch_tile(n, layer_lens, k, c_pad, l_pad_alloc, vmem_limit)
    n_padded = -(-n // n_tile) * n_tile

    # ---- pack weights (bf16) and biases (f32, zero in padded lanes) --------- #
    # (C_out, C_in, K) -> (K, C_in, C_out) -> pad channels -> bf16.
    w_blocks, b_blocks = [], []
    for (w, b) in params:
        co, ci, kk = w.shape
        wk = jnp.transpose(w, (2, 1, 0)).astype(jnp.float32)        # (K, Cin, Cout)
        wk = jnp.pad(wk, ((0, 0), (0, c_pad - ci), (0, c_pad - co)))
        w_blocks.append(wk.astype(jnp.bfloat16))
        b_blocks.append(jnp.pad(b.astype(jnp.float32),
                                (0, c_pad - co)).reshape(1, c_pad))
    w_packed = jnp.stack(w_blocks)                # (num_layers, K, C_pad, C_pad)
    b_packed = jnp.stack(b_blocks)                # (num_layers, 1, C_pad)

    # Input: NCL -> NLC (channels-last), NO channel padding (done in VMEM).
    x_nlc = jnp.transpose(x_ncl, (0, 2, 1)).astype(jnp.float32)
    if n_padded > n:
        x_nlc = jnp.pad(x_nlc, ((0, n_padded - n), (0, 0), (0, 0)))

    kernel = functools.partial(
        _stack_cnn_kernel,
        layer_lens=tuple(layer_lens), kernel_size=k, padding=padding,
        n_tile=n_tile, c_in=c_in, c_pad=c_pad, use_tap_accum=use_tap_accum)

    out = pl.pallas_call(
        kernel,
        out_shape=jax.ShapeDtypeStruct((n_padded, c_pad), jnp.float32),
        grid=(n_padded // n_tile,),
        in_specs=[
            pl.BlockSpec((n_tile, l0, c_in), lambda i: (i, 0, 0)),
            pl.BlockSpec((num_layers, k, c_pad, c_pad), lambda i: (0, 0, 0, 0)),
            pl.BlockSpec((num_layers, 1, c_pad), lambda i: (0, 0, 0)),
        ],
        out_specs=pl.BlockSpec((n_tile, c_pad), lambda i: (i, 0)),
        scratch_shapes=[
            pltpu.VMEM((n_tile, l_pad_alloc, c_pad), jnp.float32),
            pltpu.VMEM((n_tile, l_pad_alloc, c_pad), jnp.float32),
        ],
        compiler_params=pltpu.CompilerParams(
            dimension_semantics=("parallel",),
            vmem_limit_bytes=vmem_limit),
    )(x_nlc, w_packed, b_packed)

    # Lane-dense kernel output; slice to the real batch / channels here.
    return out[:n, :c_out]


# ----------------------- Parameter init (PyTorch layout) --------------------- #

def init_stack_cnn_params(key, layer_num, in_channels, out_channels,
                          kernel_size):
    """Deterministic synthetic params, PyTorch Conv1d weight layout (Cout, Cin, K)."""
    params = []
    c_in = in_channels
    for _ in range(layer_num):
        key, kw, kb = jax.random.split(key, 3)
        fan_in = c_in * kernel_size
        bound = 1.0 / np.sqrt(fan_in)
        w = jax.random.uniform(kw, (out_channels, c_in, kernel_size),
                               jnp.float32, -bound, bound)
        b = jax.random.uniform(kb, (out_channels,), jnp.float32, -bound, bound)
        params.append((w, b))
        c_in = out_channels
    return params


# --------------------------- Reference (plain JAX, f32) ----------------------- #

def _reference_forward(x_ncl, params, *, padding):
    h = jnp.transpose(x_ncl, (0, 2, 1))
    for (w, b) in params:
        wk = jnp.transpose(w, (2, 1, 0))          # (K, Cin, Cout)
        k = wk.shape[0]
        hp = jnp.pad(h, ((0, 0), (padding, padding), (0, 0)))
        l_out = hp.shape[1] - k + 1
        acc = jnp.zeros((h.shape[0], l_out, wk.shape[2]), jnp.float32)
        for kk in range(k):
            acc += jnp.einsum("nlc,co->nlo", hp[:, kk:kk + l_out, :], wk[kk])
        h = jnp.maximum(acc + b[None, None, :], 0.0)
    return jnp.max(h, axis=1)


# ---------------------------------- Main ------------------------------------- #

if __name__ == "__main__":
    # StackCNN(layer_num=3, in_channels=4, out_channels=32, kernel_size=3, padding=1)
    layer_num = 3
    in_channels = 4
    out_channels = 32
    kernel_size = 3
    padding = 1

    batch = 2
    seq_len = 16

    key = jax.random.PRNGKey(0)
    key, kx = jax.random.split(key)
    x = jax.random.normal(kx, (batch, in_channels, seq_len), jnp.float32)  # NCL

    params = init_stack_cnn_params(key, layer_num, in_channels,
                                   out_channels, kernel_size)

    fwd = jax.jit(functools.partial(stack_cnn_forward, padding=padding))
    out = fwd(x, params)
    out = jax.block_until_ready(out)
    assert out.shape == (batch, out_channels), out.shape

    ref = _reference_forward(x, params, padding=padding)
    # bf16 matmul operands (f32 accumulation) -> relaxed tolerance vs f32 ref.
    np.testing.assert_allclose(np.asarray(out), np.asarray(ref),
                               rtol=3e-2, atol=3e-2)

    print("KERNEL_OK")
</pallas_src>

<mosaic_0001>
module attributes {stable_mosaic.version = 11 : i64} {
  func.func @_stack_cnn_kernel(%arg0: i32, %arg1: memref<2x16x4xf32, #tpu.memory_space<vmem>>, %arg2: memref<3x3x128x128xbf16, #tpu.memory_space<vmem>>, %arg3: memref<3x1x128xf32, #tpu.memory_space<vmem>>, %arg4: memref<2x128xf32, #tpu.memory_space<vmem>>, %arg5: memref<2x24x128xf32, #tpu.memory_space<vmem>>, %arg6: memref<2x24x128xf32, #tpu.memory_space<vmem>>) attributes {dimension_semantics = [#tpu.dimension_semantics<parallel>], iteration_bounds = array<i64: 1>, scalar_prefetch = 0 : i64, scratch_operands = 2 : i64, tpu.core_type = #tpu.core_type<tc>, window_params = [{transform_indices = @transform_0, window_bounds = array<i64: 2, 16, 4>}, {pipeline_mode = #tpu.pipeline_mode<synchronous>, transform_indices = @transform_1, window_bounds = array<i64: 3, 3, 128, 128>}, {pipeline_mode = #tpu.pipeline_mode<synchronous>, transform_indices = @transform_2, window_bounds = array<i64: 3, 1, 128>}, {transform_indices = @transform_3, window_bounds = array<i64: 2, 128>}]} {
    %cst = arith.constant 0.000000e+00 : f32
    %0 = vector.broadcast %cst : f32 to vector<2x1x128xf32>
    %c0 = arith.constant 0 : index
    %c0_0 = arith.constant 0 : index
    %c0_1 = arith.constant 0 : index
    %1 = vector.load %arg5[%c0, %c0_0, %c0_1] : memref<2x24x128xf32, #tpu.memory_space<vmem>>, vector<2x1x128xf32>
    tpu.vector_store %arg5[%c0, %c0_0, %c0_1], %0 {strides = array<i32>} : memref<2x24x128xf32, #tpu.memory_space<vmem>>, vector<2x1x128xf32>,
    %c0_2 = arith.constant 0 : index
    %c17 = arith.constant 17 : index
    %c0_3 = arith.constant 0 : index
    %2 = vector.load %arg5[%c0_2, %c17, %c0_3] : memref<2x24x128xf32, #tpu.memory_space<vmem>>, vector<2x1x128xf32>
    tpu.vector_store %arg5[%c0_2, %c17, %c0_3], %0 {strides = array<i32>} : memref<2x24x128xf32, #tpu.memory_space<vmem>>, vector<2x1x128xf32>,
    %cst_4 = arith.constant 0.000000e+00 : f32
    %3 = vector.broadcast %cst_4 : f32 to vector<2x16x128xf32>
    %c0_5 = arith.constant 0 : index
    %c1 = arith.constant 1 : index
    %c0_6 = arith.constant 0 : index
    %4 = vector.load %arg5[%c0_5, %c1, %c0_6] : memref<2x24x128xf32, #tpu.memory_space<vmem>>, vector<2x16x128xf32>
    tpu.vector_store %arg5[%c0_5, %c1, %c0_6], %3 {strides = array<i32>} : memref<2x24x128xf32, #tpu.memory_space<vmem>>, vector<2x16x128xf32>,
    %c0_7 = arith.constant 0 : index
    %c0_8 = arith.constant 0 : index
    %c0_9 = arith.constant 0 : index
    %5 = vector.load %arg1[%c0_7, %c0_8, %c0_9] : memref<2x16x4xf32, #tpu.memory_space<vmem>>, vector<2x16x4xf32>
    %c0_10 = arith.constant 0 : index
    %c1_11 = arith.constant 1 : index
    %c0_12 = arith.constant 0 : index
    %6 = vector.load %arg5[%c0_10, %c1_11, %c0_12] : memref<2x24x128xf32, #tpu.memory_space<vmem>>, vector<2x16x4xf32>
    tpu.vector_store %arg5[%c0_10, %c1_11, %c0_12], %5 {strides = array<i32>} : memref<2x24x128xf32, #tpu.memory_space<vmem>>, vector<2x16x4xf32>,
    %c0_13 = arith.constant 0 : index
    %c0_14 = arith.constant 0 : index
    %c0_15 = arith.constant 0 : index
    %7 = vector.load %arg5[%c0_13, %c0_14, %c0_15] : memref<2x24x128xf32, #tpu.memory_space<vmem>>, vector<2x16x128xf32>
    %8 = arith.truncf %7 : vector<2x16x128xf32> to vector<2x16x128xbf16>
    %c0_16 = arith.constant 0 : index
    %c1_17 = arith.constant 1 : index
    %c0_18 = arith.constant 0 : index
    %9 = vector.load %arg5[%c0_16, %c1_17, %c0_18] : memref<2x24x128xf32, #tpu.memory_space<vmem>>, vector<2x16x128xf32>
    %10 = arith.truncf %9 : vector<2x16x128xf32> to vector<2x16x128xbf16>
    %c0_19 = arith.constant 0 : index
    %c2 = arith.constant 2 : index
    %c0_20 = arith.constant 0 : index
    %11 = vector.load %arg5[%c0_19, %c2, %c0_20] : memref<2x24x128xf32, #tpu.memory_space<vmem>>, vector<2x16x128xf32>
    %12 = arith.truncf %11 : vector<2x16x128xf32> to vector<2x16x128xbf16>
    %13 = tpu.concatenate %8, %10, %12 in 2 : vector<2x16x128xbf16>, vector<2x16x128xbf16>, vector<2x16x128xbf16> -> vector<2x16x384xbf16>
    %14 = vector.shape_cast %13 : vector<2x16x384xbf16> to vector<32x384xbf16>
    %c0_21 = arith.constant 0 : index
    %c0_22 = arith.constant 0 : index
    %c0_23 = arith.constant 0 : index
    %c0_24 = arith.constant 0 : index
    %15 = vector.load %arg2[%c0_21, %c0_22, %c0_23, %c0_24] : memref<3x3x128x128xbf16, #tpu.memory_space<vmem>>, vector<1x3x128x128xbf16>
    %16 = vector.shape_cast %15 : vector<1x3x128x128xbf16> to vector<3x128x128xbf16>
    %17 = vector.shape_cast %16 : vector<3x128x128xbf16> to vector<384x128xbf16>
    %cst_25 = arith.constant dense<0.000000e+00> : vector<32x128xf32>
    %18 = tpu.matmul %14, %17, %cst_25 {dimension_numbers = #tpu.dot_dimension_numbers<[1], [0], [0], [1], [0, 0, 1, 1], [], []>} : vector<32x384xbf16>, vector<384x128xbf16>, vector<32x128xf32> -> vector<32x128xf32>
    %c0_26 = arith.constant 0 : index
    %c0_27 = arith.constant 0 : index
    %c0_28 = arith.constant 0 : index
    %19 = vector.load %arg3[%c0_26, %c0_27, %c0_28] : memref<3x1x128xf32, #tpu.memory_space<vmem>>, vector<1x1x128xf32>
    %20 = vector.shape_cast %19 : vector<1x1x128xf32> to vector<1x128xf32>
    %21 = vector.broadcast %20 : vector<1x128xf32> to vector<32x128xf32>
    %22 = arith.addf %18, %21 : vector<32x128xf32>
    %cst_29 = arith.constant 0.000000e+00 : f32
    %23 = vector.broadcast %cst_29 : f32 to vector<32x128xf32>
    %24 = arith.maximumf %22, %23 : vector<32x128xf32>
    %cst_30 = arith.constant 0.000000e+00 : f32
    %25 = vector.broadcast %cst_30 : f32 to vector<2x1x128xf32>
    %c0_31 = arith.constant 0 : index
    %c0_32 = arith.constant 0 : index
    %c0_33 = arith.constant 0 : index
    %26 = vector.load %arg6[%c0_31, %c0_32, %c0_33] : memref<2x24x128xf32, #tpu.memory_space<vmem>>, vector<2x1x128xf32>
    tpu.vector_store %arg6[%c0_31, %c0_32, %c0_33], %25 {strides = array<i32>} : memref<2x24x128xf32, #tpu.memory_space<vmem>>, vector<2x1x128xf32>,
    %c0_34 = arith.constant 0 : index
    %c17_35 = arith.constant 17 : index
    %c0_36 = arith.constant 0 : index
    %27 = vector.load %arg6[%c0_34, %c17_35, %c0_36] : memref<2x24x128xf32, #tpu.memory_space<vmem>>, vector<2x1x128xf32>
    tpu.vector_store %arg6[%c0_34, %c17_35, %c0_36], %25 {strides = array<i32>} : memref<2x24x128xf32, #tpu.memory_space<vmem>>, vector<2x1x128xf32>,
    %28 = vector.shape_cast %24 : vector<32x128xf32> to vector<2x16x128xf32>
    %c0_37 = arith.constant 0 : index
    %c1_38 = arith.constant 1 : index
    %c0_39 = arith.constant 0 : index
    %29 = vector.load %arg6[%c0_37, %c1_38, %c0_39] : memref<2x24x128xf32, #tpu.memory_space<vmem>>, vector<2x16x128xf32>
    tpu.vector_store %arg6[%c0_37, %c1_38, %c0_39], %28 {strides = array<i32>} : memref<2x24x128xf32, #tpu.memory_space<vmem>>, vector<2x16x128xf32>,
    %c0_40 = arith.constant 0 : index
    %c0_41 = arith.constant 0 : index
    %c0_42 = arith.constant 0 : index
    %30 = vector.load %arg6[%c0_40, %c0_41, %c0_42] : memref<2x24x128xf32, #tpu.memory_space<vmem>>, vector<2x16x128xf32>
    %31 = arith.truncf %30 : vector<2x16x128xf32> to vector<2x16x128xbf16>
    %c0_43 = arith.constant 0 : index
    %c1_44 = arith.constant 1 : index
    %c0_45 = arith.constant 0 : index
    %32 = vector.load %arg6[%c0_43, %c1_44, %c0_45] : memref<2x24x128xf32, #tpu.memory_space<vmem>>, vector<2x16x128xf32>
    %33 = arith.truncf %32 : vector<2x16x128xf32> to vector<2x16x128xbf16>
    %c0_46 = arith.constant 0 : index
    %c2_47 = arith.constant 2 : index
    %c0_48 = arith.constant 0 : index
    %34 = vector.load %arg6[%c0_46, %c2_47, %c0_48] : memref<2x24x128xf32, #tpu.memory_space<vmem>>, vector<2x16x128xf32>
    %35 = arith.truncf %34 : vector<2x16x128xf32> to vector<2x16x128xbf16>
    %36 = tpu.concatenate %31, %33, %35 in 2 : vector<2x16x128xbf16>, vector<2x16x128xbf16>, vector<2x16x128xbf16> -> vector<2x16x384xbf16>
    %37 = vector.shape_cast %36 : vector<2x16x384xbf16> to vector<32x384xbf16>
    %c1_49 = arith.constant 1 : index
    %c0_50 = arith.constant 0 : index
    %c0_51 = arith.constant 0 : index
    %c0_52 = arith.constant 0 : index
    %38 = vector.load %arg2[%c1_49, %c0_50, %c0_51, %c0_52] : memref<3x3x128x128xbf16, #tpu.memory_space<vmem>>, vector<1x3x128x128xbf16>
    %39 = vector.shape_cast %38 : vector<1x3x128x128xbf16> to vector<3x128x128xbf16>
    %40 = vector.shape_cast %39 : vector<3x128x128xbf16> to vector<384x128xbf16>
    %cst_53 = arith.constant dense<0.000000e+00> : vector<32x128xf32>
    %41 = tpu.matmul %37, %40, %cst_53 {dimension_numbers = #tpu.dot_dimension_numbers<[1], [0], [0], [1], [0, 0, 1, 1], [], []>} : vector<32x384xbf16>, vector<384x128xbf16>, vector<32x128xf32> -> vector<32x128xf32>
    %c1_54 = arith.constant 1 : index
    %c0_55 = arith.constant 0 : index
    %c0_56 = arith.constant 0 : index
    %42 = vector.load %arg3[%c1_54, %c0_55, %c0_56] : memref<3x1x128xf32, #tpu.memory_space<vmem>>, vector<1x1x128xf32>
    %43 = vector.shape_cast %42 : vector<1x1x128xf32> to vector<1x128xf32>
    %44 = vector.broadcast %43 : vector<1x128xf32> to vector<32x128xf32>
    %45 = arith.addf %41, %44 : vector<32x128xf32>
    %cst_57 = arith.constant 0.000000e+00 : f32
    %46 = vector.broadcast %cst_57 : f32 to vector<32x128xf32>
    %47 = arith.maximumf %45, %46 : vector<32x128xf32>
    %cst_58 = arith.constant 0.000000e+00 : f32
    %48 = vector.broadcast %cst_58 : f32 to vector<2x1x128xf32>
    %c0_59 = arith.constant 0 : index
    %c0_60 = arith.constant 0 : index
    %c0_61 = arith.constant 0 : index
    %49 = vector.load %arg5[%c0_59, %c0_60, %c0_61] : memref<2x24x128xf32, #tpu.memory_space<vmem>>, vector<2x1x128xf32>
    tpu.vector_store %arg5[%c0_59, %c0_60, %c0_61], %48 {strides = array<i32>} : memref<2x24x128xf32, #tpu.memory_space<vmem>>, vector<2x1x128xf32>,
    %c0_62 = arith.constant 0 : index
    %c17_63 = arith.constant 17 : index
    %c0_64 = arith.constant 0 : index
    %50 = vector.load %arg5[%c0_62, %c17_63, %c0_64] : memref<2x24x128xf32, #tpu.memory_space<vmem>>, vector<2x1x128xf32>
    tpu.vector_store %arg5[%c0_62, %c17_63, %c0_64], %48 {strides = array<i32>} : memref<2x24x128xf32, #tpu.memory_space<vmem>>, vector<2x1x128xf32>,
    %51 = vector.shape_cast %47 : vector<32x128xf32> to vector<2x16x128xf32>
    %c0_65 = arith.constant 0 : index
    %c1_66 = arith.constant 1 : index
    %c0_67 = arith.constant 0 : index
    %52 = vector.load %arg5[%c0_65, %c1_66, %c0_67] : memref<2x24x128xf32, #tpu.memory_space<vmem>>, vector<2x16x128xf32>
    tpu.vector_store %arg5[%c0_65, %c1_66, %c0_67], %51 {strides = array<i32>} : memref<2x24x128xf32, #tpu.memory_space<vmem>>, vector<2x16x128xf32>,
    %c0_68 = arith.constant 0 : index
    %c0_69 = arith.constant 0 : index
    %c0_70 = arith.constant 0 : index
    %53 = vector.load %arg5[%c0_68, %c0_69, %c0_70] : memref<2x24x128xf32, #tpu.memory_space<vmem>>, vector<2x16x128xf32>
    %54 = arith.truncf %53 : vector<2x16x128xf32> to vector<2x16x128xbf16>
    %c0_71 = arith.constant 0 : index
    %c1_72 = arith.constant 1 : index
    %c0_73 = arith.constant 0 : index
    %55 = vector.load %arg5[%c0_71, %c1_72, %c0_73] : memref<2x24x128xf32, #tpu.memory_space<vmem>>, vector<2x16x128xf32>
    %56 = arith.truncf %55 : vector<2x16x128xf32> to vector<2x16x128xbf16>
    %c0_74 = arith.constant 0 : index
    %c2_75 = arith.constant 2 : index
    %c0_76 = arith.constant 0 : index
    %57 = vector.load %arg5[%c0_74, %c2_75, %c0_76] : memref<2x24x128xf32, #tpu.memory_space<vmem>>, vector<2x16x128xf32>
    %58 = arith.truncf %57 : vector<2x16x128xf32> to vector<2x16x128xbf16>
    %59 = tpu.concatenate %54, %56, %58 in 2 : vector<2x16x128xbf16>, vector<2x16x128xbf16>, vector<2x16x128xbf16> -> vector<2x16x384xbf16>
    %60 = vector.shape_cast %59 : vector<2x16x384xbf16> to vector<32x384xbf16>
    %c2_77 = arith.constant 2 : index
    %c0_78 = arith.constant 0 : index
    %c0_79 = arith.constant 0 : index
    %c0_80 = arith.constant 0 : index
    %61 = vector.load %arg2[%c2_77, %c0_78, %c0_79, %c0_80] : memref<3x3x128x128xbf16, #tpu.memory_space<vmem>>, vector<1x3x128x128xbf16>
    %62 = vector.shape_cast %61 : vector<1x3x128x128xbf16> to vector<3x128x128xbf16>
    %63 = vector.shape_cast %62 : vector<3x128x128xbf16> to vector<384x128xbf16>
    %cst_81 = arith.constant dense<0.000000e+00> : vector<32x128xf32>
    %64 = tpu.matmul %60, %63, %cst_81 {dimension_numbers = #tpu.dot_dimension_numbers<[1], [0], [0], [1], [0, 0, 1, 1], [], []>} : vector<32x384xbf16>, vector<384x128xbf16>, vector<32x128xf32> -> vector<32x128xf32>
    %c2_82 = arith.constant 2 : index
    %c0_83 = arith.constant 0 : index
    %c0_84 = arith.constant 0 : index
    %65 = vector.load %arg3[%c2_82, %c0_83, %c0_84] : memref<3x1x128xf32, #tpu.memory_space<vmem>>, vector<1x1x128xf32>
    %66 = vector.shape_cast %65 : vector<1x1x128xf32> to vector<1x128xf32>
    %67 = vector.broadcast %66 : vector<1x128xf32> to vector<32x128xf32>
    %68 = arith.addf %64, %67 : vector<32x128xf32>
    %cst_85 = arith.constant 0.000000e+00 : f32
    %69 = vector.broadcast %cst_85 : f32 to vector<32x128xf32>
    %70 = arith.maximumf %68, %69 : vector<32x128xf32>
    %71 = vector.shape_cast %70 : vector<32x128xf32> to vector<2x16x128xf32>
    %cst_86 = arith.constant dense<0xFF800000> : vector<2x128xf32>
    %72 = vector.multi_reduction <maximumf>, %71, %cst_86 [1] : vector<2x16x128xf32> to vector<2x128xf32>
    %c0_87 = arith.constant 0 : index
    %c0_88 = arith.constant 0 : index
    %73 = vector.load %arg4[%c0_87, %c0_88] : memref<2x128xf32, #tpu.memory_space<vmem>>, vector<2x128xf32>
    tpu.vector_store %arg4[%c0_87, %c0_88], %72 {strides = array<i32>} : memref<2x128xf32, #tpu.memory_space<vmem>>, vector<2x128xf32>,
    return
  }
  func.func @transform_0(%arg0: i32) -> (i32, i32, i32) {
    %c0_i32 = arith.constant 0 : i32
    %c0_i32_0 = arith.constant 0 : i32
    %c0_i32_1 = arith.constant 0 : i32
    return %arg0, %c0_i32, %c0_i32_0 : i32, i32, i32
  }
  func.func @transform_1(%arg0: i32) -> (i32, i32, i32, i32) {
    %c0_i32 = arith.constant 0 : i32
    %c0_i32_0 = arith.constant 0 : i32
    %c0_i32_1 = arith.constant 0 : i32
    %c0_i32_2 = arith.constant 0 : i32
    %c0_i32_3 = arith.constant 0 : i32
    return %c0_i32, %c0_i32_0, %c0_i32_1, %c0_i32_2 : i32, i32, i32, i32
  }
  func.func @transform_2(%arg0: i32) -> (i32, i32, i32) {
    %c0_i32 = arith.constant 0 : i32
    %c0_i32_0 = arith.constant 0 : i32
    %c0_i32_1 = arith.constant 0 : i32
    %c0_i32_2 = arith.constant 0 : i32
    return %c0_i32, %c0_i32_0, %c0_i32_1 : i32, i32, i32
  }
  func.func @transform_3(%arg0: i32) -> (i32, i32) {
    %c0_i32 = arith.constant 0 : i32
    %c0_i32_0 = arith.constant 0 : i32
    return %arg0, %c0_i32 : i32, i32
  }
}

</mosaic_0001>

<bundles_post_ra>
// kernel: stack_cnn_forward.1
= control target key start
LH: loop header
LB: loop body
LE: loop exit
PB: predicated region body
PF: predicated region fallthrough
CT: control target
= control target key end

     0   :  { %8 = vsyncpa [#allocation5], 0  ;;  %s1612_s0 = inlined_call_operand.hbm [shape: f32[2,16,4], index: 0, kind: input, shape index: {}]   ;;  %s1613_s1 = inlined_call_operand.hbm [shape: bf16[3,3,128,128], index: 1, kind: input, shape index: {}]   ;;  %s1614_s2 = inlined_call_operand.hbm [shape: f32[3,1,128], index: 2, kind: input, shape index: {}]   ;;  %s1615_s3 = inlined_call_operand.hbm [shape: f32[2,128], index: 3, kind: output, shape index: {}]  }
   0x1   :  { %9 = vsyncpa [#allocation8], 0 }
   0x2   :  { %10 = vsyncpa [#allocation6], 0  ;;  %s1513_s12 = smov [#allocation7]   ;;  %s1419_s16 = scalar_lea.hbm %s1613_s1, 9216 }
   0x3   :  { %s28_s13 = sshll.u32 %s1513_s12, 4  ;;  %p1420_p0 = scmp.ne.s32.totalorder %s1613_s1, %s1419_s16  ;;  %s29_s13 = int_to_ptr.vmem [resolvable:$true] %s28_s13 }
   0x4   :  { %p1423_p1 = scmp.lt.u32.totalorder %s1419_s16, %s1613_s1 }
   0x6   :  { %p1425_p2 = pnand %p1423_p1, %p1420_p0 }
   0x8   :  { %1428 = shalt.err (!%p1425_p2)
}
   0x9   :  { %s1429_s21 = scalar_lea.vmem %s29_s13, 9216  ;;  %p1434_p4 = scmp.lt.s32.totalorder %s29_s13, %s29_s13 }
   0xa   :  { %p1430_p3 = scmp.ne.s32.totalorder %s29_s13, %s1429_s21  ;;  %p1435_p5 = scmp.lt.s32.totalorder %s1429_s21, %s1429_s21 }
   0xc   :  { %p1436_p6 = por %p1435_p5, %p1434_p4 }
   0xe   :  { %p1437_p7 = pnand %p1436_p6, %p1430_p3 }
  0x10   :  { %1440 = shalt.err (!%p1437_p7)
}
  0x11   :  { %s1514_s22 = smov 64   ;;  %s1515_s23 = smov 4  }
  0x12   :  { %34 = dma.hbm_to_vmem [thread:$0]  %s1613_s1, 9216, %s29_s13, [#allocation8], %s1514_s22, %s1514_s22, %s1515_s23  }
  0x13   :  { %s1516_s26 = smov [#allocation4]   ;;  %s1441_s30 = scalar_lea.hbm %s1612_s0, 512 }
  0x14   :  { %s16_s27 = sshll.u32 %s1516_s26, 4  ;;  %p1442_p8 = scmp.ne.s32.totalorder %s1612_s0, %s1441_s30  ;;  %s17_s27 = int_to_ptr.vmem [resolvable:$true] %s16_s27 }
  0x15   :  { %p1445_p9 = scmp.lt.u32.totalorder %s1441_s30, %s1612_s0 }
  0x17   :  { %p1447_p10 = pnand %p1445_p9, %p1442_p8 }
  0x19   :  { %1450 = shalt.err (!%p1447_p10)
}
  0x1a   :  { %s1451_s8 = scalar_lea.vmem %s17_s27, 512  ;;  %p1456_p12 = scmp.lt.s32.totalorder %s17_s27, %s17_s27 }
  0x1b   :  { %p1452_p11 = scmp.ne.s32.totalorder %s17_s27, %s1451_s8  ;;  %p1457_p13 = scmp.lt.s32.totalorder %s1451_s8, %s1451_s8 }
  0x1d   :  { %p1458_p0 = por %p1457_p13, %p1456_p12 }
  0x1f   :  { %p1459_p1 = pnand %p1458_p0, %p1452_p11 }
  0x21   :  { %1462 = shalt.err (!%p1459_p1)
}
  0x22   :  { %s1517_s1 = smov 128   ;;  %s1518_s9 = smov 8  }
  0x23   :  { %22 = dma.hbm_to_vmem [thread:$0]  %s1612_s0, 512, %s17_s27, [#allocation5], %s1517_s1, %s1517_s1, %s1518_s9  }
  0x24   :  { %s1519_s12 = smov [#allocation9]   ;;  %s1463_s16 = scalar_lea.hbm %s1614_s2, 48 }
  0x25   :  { %s40_s13 = sshll.u32 %s1519_s12, 4  ;;  %p1464_p2 = scmp.ne.s32.totalorder %s1614_s2, %s1463_s16  ;;  %s41_s13 = int_to_ptr.vmem [resolvable:$true] %s40_s13 }
  0x26   :  { %p1467_p3 = scmp.lt.u32.totalorder %s1463_s16, %s1614_s2 }
  0x28   :  { %p1469_p4 = pnand %p1467_p3, %p1464_p2 }
  0x2a   :  { %1472 = shalt.err (!%p1469_p4)
}
  0x2b   :  { %s1473_s21 = scalar_lea.vmem %s41_s13, 48  ;;  %s1477_s0 = scalar_lea.vmem %s41_s13, 64 }
  0x2c   :  { %p1474_p5 = scmp.ne.s32.totalorder %s41_s13, %s1473_s21  ;;  %p1478_p6 = scmp.lt.s32.totalorder %s41_s13, %s41_s13 }
  0x2d   :  { %p1479_p7 = scmp.lt.s32.totalorder %s1477_s0, %s1473_s21 }
  0x2f   :  { %p1480_p8 = por %p1479_p7, %p1478_p6 }
  0x31   :  { %p1481_p9 = pnand %p1480_p8, %p1474_p5 }
  0x33   :  { %1484 = shalt.err (!%p1481_p9)
}
  0x34   :  { %s1520_s22 = smov 16   ;;  %s1521_s23 = smov 1  }
  0x35   :  { %46 = dma.hbm_to_vmem [thread:$0]  %s1614_s2, 48, %s41_s13, [#allocation8], %s1520_s22, %s1520_s22, %s1521_s23  }
  0x36   :  { %1507 = dma.done.wait [#allocation5], 512  }
  0x37   :  { %1508 = vsyncadd [#allocation5], 4294966784 }
  0x38   :  { %1509 = dma.done.wait [#allocation8], 9264  }
  0x39   :  { %1510 = vsyncadd [#allocation8], 4294958032  ;;  %v1522_v0 = vmov 0.0   ;;  %v1347_v1 = vld [vmem:[#allocation7 + $0x40] sm:$0xff]   ;;  %v1349_v3 = vld [vmem:[#allocation7 + $0x48] sm:$0xff]   ;;  %vm69_vm0 = vcmask 31744  }
  0x3a   :  { %61 = vst [vmem:[#allocation2 + $0x1] sm:$0xff] %v1522_v0  ;;  %62 = vst [vmem:[#allocation2 + $0x9] sm:$0xff] %v1522_v0  ;;  %v1348_v2 = vld [vmem:[#allocation7] sm:$0xff]   ;;  %1162 = vmatprep.subr.bf16.mxu0 %v1347_v1  ;;  %v1351_v5 = vld [vmem:[#allocation7 + $0x8] sm:$0xff]   ;;  %s1523_s2 = smov [#allocation10]   ;;  %vm1067_vm1 = vcmask 1041409  }
  0x3b   :  { %57 = vst [vmem:[#allocation2] sm:$0x1] %v1522_v0  ;;  %58 = vst [vmem:[#allocation2 + $0x18] sm:$0x1] %v1522_v0  ;;  %1163 = vmatpush3.bf16.msra.mxu0 %v1348_v2  ;;  %v1350_v4 = vld [vmem:[#allocation7 + $0x80] sm:$0xff]   ;;  %v1352_v6 = vld [vmem:[#allocation7 + $0x50] sm:$0xff]  }
  0x3c   :  { %59 = vst [vmem:[#allocation2 + $0x11] sm:$0x1] %v1522_v0  ;;  %60 = vst [vmem:[#allocation2 + $0x29] sm:$0x1] %v1522_v0  ;;  %1164 = vmatprep.subr.bf16.mxu0 %v1349_v3  ;;  %1276 = vmatprep.subr.bf16.mxu1 %v1350_v4  ;;  %v1353_v7 = vld [vmem:[#allocation7 + $0x88] sm:$0xff]   ;;  %v1354_v8 = vld [vmem:[#allocation7 + $0x10] sm:$0xff]  }
  0x3d   :  { %63 = vst [vmem:[#allocation2 + $0x19] sm:$0xff] %v1522_v0  ;;  %64 = vst [vmem:[#allocation2 + $0x21] sm:$0xff] %v1522_v0  ;;  %1277 = vmatpush3.bf16.msra.mxu1 %v1350_v4  ;;  %v1355_v9 = vld [vmem:[#allocation7 + $0x58] sm:$0xff]   ;;  %v1356_v10 = vld [vmem:[#allocation7 + $0x90] sm:$0xff]   ;;  %s1077_s26 = sshll.u32 %s1523_s2, 4  ;;  %s1078_s26 = int_to_ptr.vmem [resolvable:$true] %s1077_s26 }
  0x3e   :  { %393 = vst [vmem:[#allocation3] sm:$0x1] %v1522_v0  ;;  %394 = vst [vmem:[#allocation3 + $0x18] sm:$0x1] %v1522_v0  ;;  %1278 = vmatprep.subr.bf16.mxu1 %v1353_v7  ;;  %v1357_v11 = vld [vmem:[#allocation7 + $0x18] sm:$0xff]   ;;  %v1358_v12 = vld [vmem:[#allocation7 + $0x60] sm:$0xff]   ;;  %p1490_p11 = scmp.lt.s32.totalorder %s1078_s26, %s1078_s26 }
  0x3f   :  { %395 = vst [vmem:[#allocation3 + $0x11] sm:$0x1] %v1522_v0  ;;  %396 = vst [vmem:[#allocation3 + $0x29] sm:$0x1] %v1522_v0  ;;  %1165 = vmatpush3.bf16.msra.mxu0 %v1351_v5  ;;  %v1359_v13 = vld [vmem:[#allocation7 + $0x98] sm:$0xff]   ;;  %v1360_v14 = vld [vmem:[#allocation7 + $0x20] sm:$0xff]  }
  0x40   :  { %1166 = vmatprep.subr.bf16.mxu0 %v1352_v6  ;;  %v1362_v15 = vld [vmem:[#allocation7 + $0xa0] sm:$0xff]   ;;  %v1361_v16 = vld [vmem:[#allocation7 + $0x68] sm:$0xff]   ;;  %v1364_v19 = vld [vmem:[#allocation7 + $0x70] sm:$0xff]   ;;  %s1485_s27 = scalar_lea.vmem %s1078_s26, 32 }
  0x41   :  { %1279 = vmatpush3.bf16.msra.mxu1 %v1353_v7  ;;  %v1363_v17 = vld [vmem:[#allocation7 + $0x28] sm:$0xff]   ;;  %v1366_v20 = vld [vmem:[#allocation7 + $0x30] sm:$0xff]   ;;  %v65_v22 = vld [vmem:[#allocation4] sm:$0xff]  ;;  %p1486_p10 = scmp.ne.s32.totalorder %s1078_s26, %s1485_s27  ;;  %p1491_p12 = scmp.lt.s32.totalorder %s1485_s27, %s1485_s27 }
  0x42   :  { %1280 = vmatprep.subr.bf16.mxu1 %v1356_v10  ;;  %v1365_v18 = vld [vmem:[#allocation7 + $0xa8] sm:$0xff]   ;;  %v1368_v21 = vld [vmem:[#allocation7 + $0xb0] sm:$0xff]   ;;  %v1367_v24 = vld [vmem:[#allocation7 + $0x78] sm:$0xff]   ;;  %70 = vst.msk [vmem:[#allocation2 + $0x1] sm:$0xff] %vm69_vm0, %v65_v22 }
  0x43   :  { %1167 = vmatpush3.bf16.msra.mxu0 %v1354_v8  ;;  %v66_v23 = vld [vmem:[#allocation4 + $0x8] sm:$0xff]  ;;  %v67_v25 = vld [vmem:[#allocation4 + $0x10] sm:$0xff]  ;;  %v68_v26 = vld [vmem:[#allocation4 + $0x18] sm:$0xff]  ;;  %p1492_p13 = por %p1491_p12, %p1490_p11 }
  0x44   :  { %1168 = vmatprep.subr.bf16.mxu0 %v1355_v9  ;;  %71 = vst.msk [vmem:[#allocation2 + $0x9] sm:$0xff] %vm69_vm0, %v66_v23  ;;  %72 = vst.msk [vmem:[#allocation2 + $0x19] sm:$0xff] %vm69_vm0, %v67_v25  ;;  %v1369_v27 = vld [vmem:[#allocation7 + $0x38] sm:$0xff]   ;;  %v1371_v29 = vld [vmem:[#allocation7 + $0x100] sm:$0xff]  }
  0x45   :  { %1281 = vmatpush3.bf16.msra.mxu1 %v1356_v10  ;;  %73 = vst.msk [vmem:[#allocation2 + $0x21] sm:$0xff] %vm69_vm0, %v68_v26  ;;  %v1370_v28 = vld [vmem:[#allocation7 + $0xb8] sm:$0xff]   ;;  %v1372_v30 = vld [vmem:[#allocation7 + $0xc0] sm:$0xff]   ;;  %v1373_v39 = vld [vmem:[#allocation7 + $0x108] sm:$0xff]   ;;  %p1493_p0 = pnand %p1492_p13, %p1486_p10 }
  0x46   :  { %1282 = vmatprep.subr.bf16.mxu1 %v1359_v13  ;;  %v1375_v31 = vld [vmem:[#allocation7 + $0x140] sm:$0xff]   ;;  %v1374_v49 = vld [vmem:[#allocation7 + $0xc8] sm:$0xff]   ;;  %v1376_v51 = vld [vmem:[#allocation7 + $0x110] sm:$0xff]  }
  0x47   :  { %1169 = vmatpush3.bf16.msra.mxu0 %v1357_v11  ;;  %v1377_v53 = vld [vmem:[#allocation7 + $0xd0] sm:$0xff]   ;;  %v1378_v54 = vld [vmem:[#allocation7 + $0x148] sm:$0xff]   ;;  %v1379_v55 = vld [vmem:[#allocation7 + $0x118] sm:$0xff]  }
  0x48   :  { %1170 = vmatprep.subr.bf16.mxu0 %v1358_v12  ;;  %v1380_v56 = vld [vmem:[#allocation7 + $0xd8] sm:$0xff]   ;;  %v1381_v57 = vld [vmem:[#allocation7 + $0x150] sm:$0xff]   ;;  %v1382_v58 = vld [vmem:[#allocation7 + $0x120] sm:$0xff]  }
  0x49   :  { %1283 = vmatpush3.bf16.msra.mxu1 %v1359_v13  ;;  %v80_v32 = vld [vmem:[#allocation2 + $0x1] sm:$0xff]  ;;  %v1384_v60 = vld [vmem:[#allocation7 + $0x158] sm:$0xff]   ;;  %v1389_v1 = vld [vmem:[#allocation7 + $0xf0] sm:$0xff]  }
  0x4a   :  { %1284 = vmatprep.subr.bf16.mxu1 %v1362_v15  ;;  %v74_v34 = vld [vmem:[#allocation2] sm:$0xff]  ;;  %v1385_v61 = vld [vmem:[#allocation7 + $0x128] sm:$0xff]   ;;  %v1391_v3 = vld [vmem:[#allocation7 + $0x138] sm:$0xff]  }
  0x4b   :  { %1171 = vmatpush3.bf16.msra.mxu0 %v1360_v14  ;;  %v81_v33 = vld [vmem:[#allocation2 + $0x9] sm:$0xff]  ;;  %722 = vst [vmem:[#allocation2] sm:$0x1] %v1522_v0  ;;  %v82_v44 = vld [vmem:[#allocation2 + $0x19] sm:$0xff] }
  0x4c   :  { %1172 = vmatprep.subr.bf16.mxu0 %v1361_v16  ;;  %v84_v35 = vpack.c.bf16 %v81_v33, %v80_v32  ;;  %v75_v36 = vld [vmem:[#allocation2 + $0x8] sm:$0xff]  ;;  %v88_v42 = vld [vmem:[#allocation2 + $0x1a] sm:$0xff]  ;;  %v1393_v5 = vld [vmem:[#allocation7 + $0x170] sm:$0xff]  }
  0x4d   :  { %1285 = vmatpush3.bf16.msra.mxu1 %v1362_v15  ;;  %v86_v37 = vld [vmem:[#allocation2 + $0x2] sm:$0xff]  ;;  %v87_v38 = vld [vmem:[#allocation2 + $0xa] sm:$0xff]  ;;  %v78_v40 = vpack.c.bf16 %v75_v36, %v74_v34  ;;  %v76_v47 = vld [vmem:[#allocation2 + $0x18] sm:$0xff] }
  0x4e   :  { %1286 = vmatprep.subr.bf16.mxu1 %v1365_v18  ;;  %v90_v41 = vpack.c.bf16 %v87_v38, %v86_v37  ;;  %724 = vst [vmem:[#allocation2 + $0x11] sm:$0x1] %v1522_v0  ;;  %v89_v43 = vld [vmem:[#allocation2 + $0x22] sm:$0xff]  ;;  %323 = vmatprep.mubr.bf16.mxu0 %v84_v35  ;;  %723 = vst [vmem:[#allocation2 + $0x18] sm:$0x1] %v1522_v0  ;;  %v1392_v4 = vld [vmem:[#allocation7 + $0xf8] sm:$0xff]  }
  0x4f   :  { %1173 = vmatpush3.bf16.msra.mxu0 %v1363_v17  ;;  %v91_v45 = vpack.c.bf16 %v89_v43, %v88_v42  ;;  %725 = vst [vmem:[#allocation2 + $0x29] sm:$0x1] %v1522_v0  ;;  %v83_v46 = vld [vmem:[#allocation2 + $0x21] sm:$0xff]  ;;  %v1388_v0 = vld [vmem:[#allocation7 + $0x130] sm:$0xff]   ;;  %v1394_v6 = vld [vmem:[#allocation7 + $0x178] sm:$0xff]  }
  0x50   :  { %1174 = vmatprep.subr.bf16.mxu0 %v1364_v19  ;;  %v77_v48 = vld [vmem:[#allocation2 + $0x20] sm:$0xff]  ;;  %1292 = vmatprep.mubr.bf16.mxu1 %v90_v41  ;;  %v85_v50 = vpack.c.bf16 %v83_v46, %v82_v44  ;;  %v1386_v62 = vld [vmem:[#allocation7 + $0xe8] sm:$0xff]  }
  0x51   :  { %1287 = vmatpush3.bf16.msra.mxu1 %v1365_v18  ;;  %v79_v52 = vpack.c.bf16 %v77_v48, %v76_v47  ;;  %v1383_v59 = vld [vmem:[#allocation7 + $0xe0] sm:$0xff]   ;;  %v1390_v2 = vld [vmem:[#allocation7 + $0x168] sm:$0xff]  }
  0x52   :  { %1288 = vmatprep.subr.bf16.mxu1 %v1368_v21  ;;  %v1387_v63 = vld [vmem:[#allocation7 + $0x160] sm:$0xff]   ;;  %v1397_v47 = vld [vmem:[#allocation7 + $0x1c8] sm:$0xff]  }
  0x53   :  { %1175 = vmatpush3.bf16.msra.mxu0 %v1366_v20  ;;  %v1395_v7 = vld [vmem:[#allocation7 + $0x1c0] sm:$0xff]   ;;  %v1399_v48 = vld [vmem:[#allocation7 + $0x188] sm:$0xff]  }
  0x54   :  { %1176 = vmatprep.subr.bf16.mxu0 %v1367_v24  ;;  %v1398_v8 = vld [vmem:[#allocation7 + $0x200] sm:$0xff]  }
  0x55   :  { %1289 = vmatpush3.bf16.msra.mxu1 %v1368_v21  ;;  %v1087_v11 = vld [vmem:[#allocation9] ss:$0 sm:$0xff] }
  0x56   :  { %1290 = vmatprep.subr.bf16.mxu1 %v1370_v28 }
  0x57   :  { %1177 = vmatpush3.bf16.msra.mxu0 %v1369_v27 }
  0x58   :  { %1200 = vmatprep.subr.bf16.mxu0 %v1371_v29 }
  0x59   :  { %1291 = vmatpush3.bf16.msra.mxu1 %v1370_v28 }
  0x5a   :  { %324 = vmatmul.mubr.bf16.vlgmr.msra.gmra.mrb[0].mxu0 %v78_v40  ;;  %1296 = vmatprep.subr.bf16.mxu1 %v1375_v31  ;;  %v1396_v40 = vld [vmem:[#allocation7 + $0x180] sm:$0xff]  }
  0x5b   :  { %1201 = vmatpush3.bf16.msra.mxu0 %v1372_v30  ;;  %331 = vmatprep.mubr.bf16.mxu0 %v85_v50 }
  0x5c   :  { %1293 = vmatmul.mubr.bf16.vlgmr.msra.gmra.mrb[0].mxu1 %v91_v45  ;;  %1202 = vmatprep.subr.bf16.mxu0 %v1373_v39 }
  0x5d   :  { %1297 = vmatpush3.bf16.msra.mxu1 %v1375_v31 }
  0x5e   :  { %1298 = vmatprep.subr.bf16.mxu1 %v1378_v54 }
  0x5f   :  { %1203 = vmatpush3.bf16.msra.mxu0 %v1374_v49 }
  0x60   :  { %1204 = vmatprep.subr.bf16.mxu0 %v1376_v51 }
  0x61   :  { %1299 = vmatpush3.bf16.msra.mxu1 %v1378_v54 }
  0x62   :  { %332 = vmatmul.mubr.bf16.gmra.mrb[4].mxu0 %v79_v52  ;;  %1300 = vmatprep.subr.bf16.mxu1 %v1381_v57 }
  0x63   :  { %1205 = vmatpush3.bf16.msra.mxu0 %v1377_v53 }
  0x64   :  { %1206 = vmatprep.subr.bf16.mxu0 %v1379_v55  ;;  %v1400_v55 = vld [vmem:[#allocation7 + $0x1d0] sm:$0xff]  }
  0x65   :  { %1301 = vmatpush3.bf16.msra.mxu1 %v1381_v57  ;;  %v1402_v57 = vld [vmem:[#allocation7 + $0x190] sm:$0xff]  }
  0x66   :  { %1302 = vmatprep.subr.bf16.mxu1 %v1384_v60 }
  0x67   :  { %1207 = vmatpush3.bf16.msra.mxu0 %v1380_v56  ;;  %v1401_v56 = vld [vmem:[#allocation7 + $0x208] sm:$0xff]  }
  0x68   :  { %1208 = vmatprep.subr.bf16.mxu0 %v1382_v58  ;;  %v1403_v58 = vld [vmem:[#allocation7 + $0x1d8] sm:$0xff]  }
  0x69   :  { %1303 = vmatpush3.bf16.msra.mxu1 %v1384_v60  ;;  %v1405_v60 = vld [vmem:[#allocation7 + $0x198] sm:$0xff]  }
  0x6a   :  { %1304 = vmatprep.subr.bf16.mxu1 %v1387_v63 }
  0x6b   :  { %1209 = vmatpush3.bf16.msra.mxu0 %v1383_v59  ;;  %v1404_v59 = vld [vmem:[#allocation7 + $0x210] sm:$0xff]  }
  0x6c   :  { %1210 = vmatprep.subr.bf16.mxu0 %v1385_v61  ;;  %v1406_v61 = vld [vmem:[#allocation7 + $0x1e0] sm:$0xff]  }
  0x6d   :  { %1305 = vmatpush3.bf16.msra.mxu1 %v1387_v63  ;;  %v1408_v63 = vld [vmem:[#allocation7 + $0x1a0] sm:$0xff]  }
  0x6e   :  { %1306 = vmatprep.subr.bf16.mxu1 %v1390_v2 }
  0x6f   :  { %1211 = vmatpush3.bf16.msra.mxu0 %v1386_v62  ;;  %v1407_v62 = vld [vmem:[#allocation7 + $0x218] sm:$0xff]  }
  0x70   :  { %1212 = vmatprep.subr.bf16.mxu0 %v1388_v0  ;;  %v1409_v0 = vld [vmem:[#allocation7 + $0x1e8] sm:$0xff]  }
  0x71   :  { %1307 = vmatpush3.bf16.msra.mxu1 %v1390_v2  ;;  %v1411_v2 = vld [vmem:[#allocation7 + $0x1a8] sm:$0xff]  }
  0x72   :  { %1308 = vmatprep.subr.bf16.mxu1 %v1393_v5 }
  0x73   :  { %1213 = vmatpush3.bf16.msra.mxu0 %v1389_v1  ;;  %v1410_v1 = vld [vmem:[#allocation7 + $0x220] sm:$0xff]  }
  0x74   :  { %1214 = vmatprep.subr.bf16.mxu0 %v1391_v3  ;;  %v1412_v3 = vld [vmem:[#allocation7 + $0x1f0] sm:$0xff]  }
  0x75   :  { %1309 = vmatpush3.bf16.msra.mxu1 %v1393_v5  ;;  %v1414_v5 = vld [vmem:[#allocation7 + $0x1b0] sm:$0xff]  }
  0x76   :  { %1310 = vmatprep.subr.bf16.mxu1 %v1394_v6 }
  0x77   :  { %1215 = vmatpush3.bf16.msra.mxu0 %v1392_v4  ;;  %v1413_v4 = vld [vmem:[#allocation7 + $0x228] sm:$0xff]  }
  0x78   :  { %1238 = vmatprep.subr.bf16.mxu0 %v1395_v7  ;;  %v1416_v7 = vld [vmem:[#allocation7 + $0x230] sm:$0xff]  }
  0x79   :  { %1311 = vmatpush3.bf16.msra.mxu1 %v1394_v6  ;;  %v1415_v6 = vld [vmem:[#allocation7 + $0x1f8] sm:$0xff]  }
  0x7a   :  { %1316 = vmatprep.subr.bf16.mxu1 %v1398_v8 }
 0x12d   :  { %v1178_v9 = vpop.f32.mrb[0].mxu0 }
 0x12e   :  { %v1179_v10 = vpop.f32.mrb[1].mxu0 }
 0x12f   :  { %v1180_v12 = vadd.f32 %v1179_v10, %v1178_v9  ;;  %v1181_v13 = vpop.f32.mrb[2].mxu0  ;;  %v1294_v14 = vpop.f32.mrb[0].mxu1  ;;  %v1418_v9 = vld [vmem:[#allocation7 + $0x238] sm:$0xff]  }
 0x130   :  { %v1182_v15 = vpop.f32.mrb[3].mxu0  ;;  %v374_v16 = vpop.f32.mrb[1].mxu1 }
 0x131   :  { %v1183_v17 = vadd.f32 %v1182_v15, %v1181_v13  ;;  %v326_v18 = vadd.f32 %v1180_v12, %v1087_v11  ;;  %v1295_v19 = vpop.f32.mrb[2].mxu1 }
 0x132   :  { %v377_v20 = vpop.f32.mrb[3].mxu1 }
 0x133   :  { %v375_v21 = vadd.f32 %v374_v16, %v326_v18  ;;  %v329_v22 = vadd.f32 %v1183_v17, %v1087_v11  ;;  %v1112_v16 = vld [vmem:[#allocation9 + $0x1] ss:$0 sm:$0xff] }
 0x135   :  { %v389_v23 = vmax.f32 %v375_v21, 0.0  ;;  %v378_v24 = vadd.f32 %v377_v20, %v329_v22  ;;  %v1184_v25 = vpop.f32.mrb[4].mxu0 }
 0x136   :  { %v1185_v26 = vpop.f32.mrb[5].mxu0 }
 0x137   :  { %397 = vst [vmem:[#allocation3 + $0x1] sm:$0xff] %v389_v23  ;;  %v390_v27 = vmax.f32 %v378_v24, 0.0  ;;  %v1186_v28 = vadd.f32 %v1185_v26, %v1184_v25  ;;  %v1187_v29 = vpop.f32.mrb[6].mxu0 }
 0x138   :  { %v1188_v30 = vpop.f32.mrb[7].mxu0 }
 0x139   :  { %398 = vst [vmem:[#allocation3 + $0x9] sm:$0xff] %v390_v27  ;;  %v334_v31 = vadd.f32 %v1186_v28, %v1087_v11  ;;  %v1189_v32 = vadd.f32 %v1188_v30, %v1187_v29  ;;  %v411_v33 = vpack.c.bf16 %v390_v27, %v389_v23 }
 0x13b   :  { %v383_v34 = vadd.f32 %v1294_v14, %v334_v31  ;;  %v337_v35 = vadd.f32 %v1189_v32, %v1087_v11  ;;  %652 = vmatprep.mubr.bf16.mxu0 %v411_v33 }
 0x13d   :  { %v391_v36 = vmax.f32 %v383_v34, 0.0  ;;  %v386_v37 = vadd.f32 %v1295_v19, %v337_v35 }
 0x13e   :  { %v401_v39 = vld [vmem:[#allocation3] sm:$0xff] }
 0x13f   :  { %399 = vst [vmem:[#allocation3 + $0x19] sm:$0xff] %v391_v36  ;;  %v392_v38 = vmax.f32 %v386_v37, 0.0 }
 0x140   :  { %v413_v41 = vld [vmem:[#allocation3 + $0x2] sm:$0xff]  ;;  %v414_v42 = vld [vmem:[#allocation3 + $0xa] sm:$0xff] }
 0x141   :  { %v402_v43 = vld [vmem:[#allocation3 + $0x8] sm:$0xff]  ;;  %400 = vst [vmem:[#allocation3 + $0x21] sm:$0xff] %v392_v38  ;;  %v417_v44 = vpack.c.bf16 %v414_v42, %v413_v41  ;;  %v412_v46 = vpack.c.bf16 %v392_v38, %v391_v36 }
 0x142   :  { %v405_v45 = vpack.c.bf16 %v402_v43, %v401_v39 }
 0x143   :  { %1312 = vmatprep.mubr.bf16.mxu1 %v417_v44 }
 0x144   :  { %653 = vmatmul.mubr.bf16.vlgmr.msra.gmra.mrb[8].mxu0 %v405_v45 }
 0x145   :  { %660 = vmatprep.mubr.bf16.mxu0 %v412_v46  ;;  %1239 = vmatpush3.bf16.msra.mxu0 %v1396_v40 }
 0x146   :  { %1240 = vmatprep.subr.bf16.mxu0 %v1397_v47  ;;  %v403_v49 = vld [vmem:[#allocation3 + $0x18] sm:$0xff] }
 0x148   :  { %v415_v50 = vld [vmem:[#allocation3 + $0x1a] sm:$0xff]  ;;  %v416_v51 = vld [vmem:[#allocation3 + $0x22] sm:$0xff] }
 0x149   :  { %v404_v52 = vld [vmem:[#allocation3 + $0x20] sm:$0xff]  ;;  %1241 = vmatpush3.bf16.msra.mxu0 %v1399_v48  ;;  %v418_v53 = vpack.c.bf16 %v416_v51, %v415_v50 }
 0x14a   :  { %v406_v54 = vpack.c.bf16 %v404_v52, %v403_v49  ;;  %1242 = vmatprep.subr.bf16.mxu0 %v1400_v55  ;;  %v1137_v55 = vld [vmem:[#allocation9 + $0x2] ss:$0 sm:$0xff] }
 0x14b   :  { %1313 = vmatmul.mubr.bf16.vlgmr.msra.gmra.mrb[4].mxu1 %v418_v53 }
 0x14c   :  { %661 = vmatmul.mubr.bf16.gmra.mrb[12].mxu0 %v406_v54  ;;  %1317 = vmatpush3.bf16.msra.mxu1 %v1398_v8  ;;  %v1417_v8 = vld [vmem:[#allocation7 + $0x1b8] sm:$0xff]  }
 0x14d   :  { %1318 = vmatprep.subr.bf16.mxu1 %v1401_v56  ;;  %1243 = vmatpush3.bf16.msra.mxu0 %v1402_v57 }
 0x14e   :  { %1244 = vmatprep.subr.bf16.mxu0 %v1403_v58 }
 0x150   :  { %1319 = vmatpush3.bf16.msra.mxu1 %v1401_v56 }
 0x151   :  { %1320 = vmatprep.subr.bf16.mxu1 %v1404_v59  ;;  %1245 = vmatpush3.bf16.msra.mxu0 %v1405_v60 }
 0x152   :  { %1246 = vmatprep.subr.bf16.mxu0 %v1406_v61 }
 0x154   :  { %1321 = vmatpush3.bf16.msra.mxu1 %v1404_v59 }
 0x155   :  { %1322 = vmatprep.subr.bf16.mxu1 %v1407_v62  ;;  %1247 = vmatpush3.bf16.msra.mxu0 %v1408_v63 }
 0x156   :  { %1248 = vmatprep.subr.bf16.mxu0 %v1409_v0 }
 0x158   :  { %1323 = vmatpush3.bf16.msra.mxu1 %v1407_v62 }
 0x159   :  { %1324 = vmatprep.subr.bf16.mxu1 %v1410_v1  ;;  %1249 = vmatpush3.bf16.msra.mxu0 %v1411_v2 }
 0x15a   :  { %1250 = vmatprep.subr.bf16.mxu0 %v1412_v3 }
 0x15c   :  { %1325 = vmatpush3.bf16.msra.mxu1 %v1410_v1 }
 0x15d   :  { %1326 = vmatprep.subr.bf16.mxu1 %v1413_v4  ;;  %1251 = vmatpush3.bf16.msra.mxu0 %v1414_v5 }
 0x15e   :  { %1252 = vmatprep.subr.bf16.mxu0 %v1415_v6 }
 0x160   :  { %1327 = vmatpush3.bf16.msra.mxu1 %v1413_v4 }
 0x161   :  { %1328 = vmatprep.subr.bf16.mxu1 %v1416_v7  ;;  %1253 = vmatpush3.bf16.msra.mxu0 %v1417_v8 }
 0x164   :  { %1329 = vmatpush3.bf16.msra.mxu1 %v1416_v7 }
 0x165   :  { %1330 = vmatprep.subr.bf16.mxu1 %v1418_v9 }
 0x168   :  { %1331 = vmatpush3.bf16.msra.mxu1 %v1418_v9 }
 0x217   :  { %v1216_v10 = vpop.f32.mrb[8].mxu0 }
 0x218   :  { %v1217_v11 = vpop.f32.mrb[9].mxu0 }
 0x219   :  { %v1218_v12 = vadd.f32 %v1217_v11, %v1216_v10  ;;  %v1219_v13 = vpop.f32.mrb[10].mxu0 }
 0x21a   :  { %v1220_v14 = vpop.f32.mrb[11].mxu0 }
 0x21b   :  { %v1221_v15 = vadd.f32 %v1220_v14, %v1219_v13  ;;  %v655_v19 = vadd.f32 %v1218_v12, %v1112_v16 }
 0x21d   :  { %v658_v26 = vadd.f32 %v1221_v15, %v1112_v16 }
 0x21e   :  { %v1314_v17 = vpop.f32.mrb[4].mxu1 }
 0x21f   :  { %v1222_v18 = vpop.f32.mrb[12].mxu0  ;;  %v703_v20 = vpop.f32.mrb[5].mxu1 }
 0x220   :  { %v1223_v21 = vpop.f32.mrb[13].mxu0  ;;  %v704_v22 = vadd.f32 %v703_v20, %v655_v19  ;;  %v1315_v24 = vpop.f32.mrb[6].mxu1 }
 0x221   :  { %v1224_v23 = vadd.f32 %v1223_v21, %v1222_v18  ;;  %v1225_v25 = vpop.f32.mrb[14].mxu0  ;;  %v706_v27 = vpop.f32.mrb[7].mxu1 }
 0x222   :  { %v1226_v28 = vpop.f32.mrb[15].mxu0  ;;  %v718_v29 = vmax.f32 %v704_v22, 0.0  ;;  %v707_v31 = vadd.f32 %v706_v27, %v658_v26 }
 0x223   :  { %v663_v30 = vadd.f32 %v1224_v23, %v1112_v16  ;;  %v1227_v32 = vadd.f32 %v1226_v28, %v1225_v25 }
 0x224   :  { %726 = vst [vmem:[#allocation2 + $0x1] sm:$0xff] %v718_v29  ;;  %v719_v34 = vmax.f32 %v707_v31, 0.0 }
 0x225   :  { %v712_v33 = vadd.f32 %v1314_v17, %v663_v30  ;;  %v666_v35 = vadd.f32 %v1227_v32, %v1112_v16 }
 0x226   :  { %727 = vst [vmem:[#allocation2 + $0x9] sm:$0xff] %v719_v34  ;;  %v740_v38 = vpack.c.bf16 %v719_v34, %v718_v29 }
 0x227   :  { %v720_v36 = vmax.f32 %v712_v33, 0.0  ;;  %v715_v37 = vadd.f32 %v1315_v24, %v666_v35 }
 0x228   :  { %981 = vmatprep.mubr.bf16.mxu0 %v740_v38 }
 0x229   :  { %728 = vst [vmem:[#allocation2 + $0x19] sm:$0xff] %v720_v36  ;;  %v721_v39 = vmax.f32 %v715_v37, 0.0 }
 0x22b   :  { %729 = vst [vmem:[#allocation2 + $0x21] sm:$0xff] %v721_v39  ;;  %v741_v40 = vpack.c.bf16 %v721_v39, %v720_v36  ;;  %v730_v41 = vld [vmem:[#allocation2] sm:$0xff] }
 0x22d   :  { %v742_v42 = vld [vmem:[#allocation2 + $0x2] sm:$0xff]  ;;  %v743_v43 = vld [vmem:[#allocation2 + $0xa] sm:$0xff] }
 0x22e   :  { %v731_v44 = vld [vmem:[#allocation2 + $0x8] sm:$0xff]  ;;  %v746_v45 = vpack.c.bf16 %v743_v43, %v742_v42 }
 0x22f   :  { %v734_v46 = vpack.c.bf16 %v731_v44, %v730_v41 }
 0x230   :  { %1332 = vmatprep.mubr.bf16.mxu1 %v746_v45  ;;  %v732_v51 = vld [vmem:[#allocation2 + $0x18] sm:$0xff] }
 0x231   :  { %982 = vmatmul.mubr.bf16.vlgmr.msra.gmra.mrb[16].mxu0 %v734_v46 }
 0x232   :  { %989 = vmatprep.mubr.bf16.mxu0 %v741_v40  ;;  %v744_v47 = vld [vmem:[#allocation2 + $0x1a] sm:$0xff]  ;;  %v745_v48 = vld [vmem:[#allocation2 + $0x22] sm:$0xff] }
 0x233   :  { %v747_v49 = vpack.c.bf16 %v745_v48, %v744_v47  ;;  %v733_v50 = vld [vmem:[#allocation2 + $0x20] sm:$0xff] }
 0x234   :  { %v735_v52 = vpack.c.bf16 %v733_v50, %v732_v51 }
 0x235   :  { %1333 = vmatmul.mubr.bf16.vlgmr.msra.gmra.mrb[8].mxu1 %v747_v49 }
 0x239   :  { %990 = vmatmul.mubr.bf16.gmra.mrb[20].mxu0 %v735_v52 }
 0x304   :  { %v1254_v53 = vpop.f32.mrb[16].mxu0 }
 0x305   :  { %v1255_v54 = vpop.f32.mrb[17].mxu0 }
 0x306   :  { %v1256_v56 = vadd.f32 %v1255_v54, %v1254_v53  ;;  %v1257_v57 = vpop.f32.mrb[18].mxu0 }
 0x307   :  { %v1258_v58 = vpop.f32.mrb[19].mxu0 }
 0x308   :  { %v1259_v59 = vadd.f32 %v1258_v58, %v1257_v57  ;;  %v1334_v60 = vpop.f32.mrb[8].mxu1  ;;  %v984_v61 = vadd.f32 %v1256_v56, %v1137_v55 }
 0x309   :  { %v1032_v62 = vpop.f32.mrb[9].mxu1 }
 0x30a   :  { %v1033_v63 = vadd.f32 %v1032_v62, %v984_v61  ;;  %v1335_v0 = vpop.f32.mrb[10].mxu1  ;;  %v987_v1 = vadd.f32 %v1259_v59, %v1137_v55 }
 0x30b   :  { %v1035_v2 = vpop.f32.mrb[11].mxu1 }
 0x30c   :  { %v1036_v3 = vadd.f32 %v1035_v2, %v987_v1  ;;  %v1260_v4 = vpop.f32.mrb[20].mxu0  ;;  %v1047_v6 = vmax.f32 %v1033_v63, 0.0 }
 0x30d   :  { %v1261_v5 = vpop.f32.mrb[21].mxu0 }
 0x30e   :  { %v1048_v7 = vmax.f32 %v1036_v3, 0.0  ;;  %v1262_v8 = vadd.f32 %v1261_v5, %v1260_v4  ;;  %v1263_v9 = vpop.f32.mrb[22].mxu0 }
 0x30f   :  { %v1264_v10 = vpop.f32.mrb[23].mxu0 }
 0x310   :  { %v1051_v11 = vmax.f32 %v1047_v6, %v1048_v7  ;;  %v992_v12 = vadd.f32 %v1262_v8, %v1137_v55  ;;  %v1265_v13 = vadd.f32 %v1264_v10, %v1263_v9 }
 0x312   :  { %v1052_v14 = vrot.slane %v1051_v11, 4  ;;  %v1041_v15 = vadd.f32 %v1334_v60, %v992_v12  ;;  %v995_v16 = vadd.f32 %v1265_v13, %v1137_v55 }
 0x314   :  { %v1053_v17 = vmax.f32 %v1051_v11, %v1052_v14  ;;  %v1044_v18 = vadd.f32 %v1335_v0, %v995_v16  ;;  %v1049_v19 = vmax.f32 %v1041_v15, 0.0 }
 0x316   :  { %v1050_v20 = vmax.f32 %v1044_v18, 0.0  ;;  %v1054_v21 = vrot.slane %v1053_v17, 2 }
 0x318   :  { %v1058_v22 = vmax.f32 %v1049_v19, %v1050_v20  ;;  %v1055_v24 = vmax.f32 %v1053_v17, %v1054_v21 }
 0x31a   :  { %v1059_v23 = vrot.slane %v1058_v22, 4  ;;  %v1056_v27 = vrot.slane %v1055_v24, 1 }
 0x31c   :  { %v1060_v25 = vmax.f32 %v1058_v22, %v1059_v23  ;;  %v1057_v30 = vmax.f32 %v1055_v24, %v1056_v27 }
 0x31e   :  { %v1061_v26 = vrot.slane %v1060_v25, 2 }
 0x320   :  { %v1062_v28 = vmax.f32 %v1060_v25, %v1061_v26 }
 0x322   :  { %v1063_v29 = vrot.slane %v1062_v28, 1 }
 0x324   :  { %v1064_v31 = vmax.f32 %v1062_v28, %v1063_v29 }
 0x326   :  { %v1068_v32 = vsel %vm1067_vm1, %v1064_v31, %v1057_v30 }
 0x327   :  { %1070 = vst [vmem:[#allocation10] sm:$0x3] %v1068_v32 }
 0x328   :  { %1496 = shalt.err (!%p1493_p0)
}
 0x329   :  { %s1497_s30 = scalar_lea.hbm %s1615_s3, 32 }
 0x32a   :  { %p1498_p1 = scmp.ne.s32.totalorder %s1615_s3, %s1497_s30  ;;  %p1501_p2 = scmp.lt.u32.totalorder %s1497_s30, %s1615_s3 }
 0x32c   :  { %p1503_p3 = pnand %p1501_p2, %p1498_p1 }
 0x32e   :  { %1506 = shalt.err (!%p1503_p3)
}
 0x32f   :  { %1080 = dma.vmem_to_hbm [thread:$0]  %s1078_s26, 32, %s1615_s3, [#allocation6]  }
 0x330   :  { %1511 = dma.done.wait [#allocation6], 32  }
 0x331   :  { %1512 = vsyncadd [#allocation6], 4294967264 }
 0x332   :  { %1084 = vsyncpa [#allocation5], 1 }
 0x333   :  { %1085 = vsyncpa [#allocation8], 1 }
 0x334   :  { %1086 = vsyncpa [#allocation6], 1 }

</bundles_post_ra>
